<compile_context>
chip_gen: v7x
topology: tpu7x:2x2x1
jax: 0.10.0
libtpu: 0.0.40
codegen_flags: <defaults>
</compile_context>

<pallas_src>
import jax
import jax.numpy as jnp
from jax import lax
from jax.experimental import pallas as pl
from jax.experimental.pallas import tpu as pltpu

LN_EPS = 1e-5  # PyTorch nn.LayerNorm default eps


def _velocity_kernel(up_ref, dn_ref, w1_ref, w2_ref, vec_ref, scal_ref, out_ref):
    """One lane-major column tile of the full forward pass.

    up_ref / dn_ref : (tile_m, T) natural row-major input tiles
    w1_ref          : (2H, T)  stacked Linear(T->H) weights [w11^T ; w21^T]
    w2_ref          : (2, H)   stacked Linear(H->1) weights [w12 ; w22]
    vec_ref         : (2H, 3)  columns = [linear1 bias, LN gamma, LN beta]
    scal_ref        : (5,) SMEM scalars [b12, b22, w3_up, w3_down, b3]
    out_ref         : (1, tile_m) lane-dense output row
    """
    H = w2_ref.shape[1]

    w1 = w1_ref[...]                       # (2H, T)
    vec = vec_ref[...]                     # (2H, 3)
    bias, gamma, beta = vec[:, 0:1], vec[:, 1:2], vec[:, 2:3]

    # Contract the T axis of both operands: (H, T) x (tile_m, T) -> (H, tile_m).
    # The transpose of the natural row-major input tile is absorbed by the MXU.
    dims = (((1,), (1,)), ((), ()))

    def head(x, w1h, b1, g, be, w2row, b2):
        h = lax.dot_general(w1h, x, dims,
                            preferred_element_type=jnp.float32) + b1   # (H, L)
        # Dropout(p=0.5) -> identity in eval mode.
        # TODO(synk): training-mode dropout (stochastic mask) not implemented.
        mu = jnp.mean(h, axis=0, keepdims=True)                        # (1, L)
        var = jnp.mean(h * h, axis=0, keepdims=True) - mu * mu
        var = jnp.maximum(var, 0.0)        # guard one-pass cancellation
        hn = (h - mu) * lax.rsqrt(var + LN_EPS) * g + be
        hn = jnp.maximum(hn, 0.0)                                      # ReLU
        # Linear(H->1) on the (idle) MXU instead of VPU mul + XLU reduce.
        y = jnp.dot(w2row, hn, preferred_element_type=jnp.float32) + b2
        return jax.nn.sigmoid(y)                                       # (1, L)

    y_up = head(up_ref[...], w1[:H], bias[:H], gamma[:H], beta[:H],
                w2_ref[0:1, :], scal_ref[0])
    y_dn = head(dn_ref[...], w1[H:], bias[H:], gamma[H:], beta[H:],
                w2_ref[1:2, :], scal_ref[1])

    # cat((x_up, x_down), dim=2) + Linear(2 -> 1) == weighted sum.
    out_ref[...] = y_up * scal_ref[2] + y_dn * scal_ref[3] + scal_ref[4]


def pack_params(p):
    """Pack the module parameters into 4 kernel-friendly arrays."""
    T, H = p["w11"].shape
    f32 = jnp.float32

    # Stacked Linear(T->H) weights, already transposed to (H, T) per branch.
    w1 = jnp.concatenate([p["w11"].T, p["w21"].T], axis=0).astype(f32)   # (2H, T)

    col = lambda a, b: jnp.concatenate(
        [a.reshape(H, 1), b.reshape(H, 1)], axis=0)
    vec = jnp.concatenate(
        [col(p["b11"], p["b21"]),     # linear1 bias
         col(p["g11"], p["g21"]),     # LayerNorm weight
         col(p["be11"], p["be21"])],  # LayerNorm bias
        axis=1).astype(f32)           # (2H, 3)

    w2 = jnp.stack([p["w12"].reshape(H), p["w22"].reshape(H)],
                   axis=0).astype(f32)                                   # (2, H)

    scal = jnp.stack(
        [p["b12"][0, 0], p["b22"][0, 0],
         p["w3"][0, 0], p["w3"][0, 1], p["b3"][0, 0]]).astype(f32)       # (5,)

    return w1, w2, vec, scal


def velocity_model_nam_forward(upstream, downstream, params, *, tile_m=8192):
    """upstream/downstream: (B, N, T) float32. Returns (N, B) float32."""
    B, N, T = upstream.shape
    M = B * N
    w1, w2, vec, scal = pack_params(params)
    H = w2.shape[1]

    # Free (bitcast) reshapes: natural row-major (M, T) inputs, no HBM passes.
    up = upstream.reshape(M, T)
    dn = downstream.reshape(M, T)

    if M <= tile_m:
        # Single full-extent block: block_shape == full array dims, so the
        # (8, 128) divisibility rule does not apply (any M is allowed).
        tm = M
    else:
        assert tile_m % 128 == 0, "tiled path needs a lane-multiple tile_m"
        tm = tile_m
    # Ragged tail (M % tm != 0) handled by Pallas' clipped boundary blocks:
    # columns are independent, OOB output columns are never written back.
    grid = (pl.cdiv(M, tm),)

    out = pl.pallas_call(
        _velocity_kernel,
        out_shape=jax.ShapeDtypeStruct((1, M), jnp.float32),
        grid_spec=pltpu.PrefetchScalarGridSpec(
            num_scalar_prefetch=0,
            grid=grid,
            in_specs=[
                pl.BlockSpec((tm, T), lambda i: (i, 0)),        # upstream tile
                pl.BlockSpec((tm, T), lambda i: (i, 0)),        # downstream tile
                pl.BlockSpec((2 * H, T), lambda i: (0, 0)),     # stacked w1
                pl.BlockSpec((2, H), lambda i: (0, 0)),         # stacked w2
                pl.BlockSpec((2 * H, 3), lambda i: (0, 0)),     # bias/gamma/beta
                pl.BlockSpec(memory_space=pltpu.MemorySpace.SMEM),  # 5 scalars
            ],
            out_specs=pl.BlockSpec((1, tm), lambda i: (0, i)),  # lane-dense out
        ),
        compiler_params=pltpu.CompilerParams(
            dimension_semantics=("parallel",),
            vmem_limit_bytes=48 * 1024 * 1024),
    )(up, dn, w1, w2, vec, scal)

    # out.squeeze(2).transpose(1, 0)  ->  (N, B)
    return out[0].reshape(B, N).transpose(1, 0)


def init_params(key, num_timesteps_input, hidden_units):
    """Deterministic synthetic parameters (shapes match the PyTorch module)."""
    T, H = num_timesteps_input, hidden_units
    ks = jax.random.split(key, 10)
    f32 = jnp.float32
    return {
        # Linear(T -> H): stored already transposed, y = x @ w + b
        "w11": jax.random.normal(ks[0], (T, H), f32) * 0.1,
        "b11": jax.random.normal(ks[1], (1, H), f32) * 0.1,
        "g11": jnp.ones((1, H), f32),    # LayerNorm weight
        "be11": jnp.zeros((1, H), f32),  # LayerNorm bias
        "w12": jax.random.normal(ks[2], (H, 1), f32) * 0.1,
        "b12": jax.random.normal(ks[3], (1, 1), f32) * 0.1,
        "w21": jax.random.normal(ks[4], (T, H), f32) * 0.1,
        "b21": jax.random.normal(ks[5], (1, H), f32) * 0.1,
        "g21": jnp.ones((1, H), f32),
        "be21": jnp.zeros((1, H), f32),
        "w22": jax.random.normal(ks[6], (H, 1), f32) * 0.1,
        "b22": jax.random.normal(ks[7], (1, 1), f32) * 0.1,
        "w3": jax.random.normal(ks[8], (1, 2), f32) * 0.1,
        "b3": jax.random.normal(ks[9], (1, 1), f32) * 0.1,
    }


def reference_forward(upstream, downstream, p):
    """Pure-JAX reference mirroring the PyTorch forward (eval mode)."""
    def branch(x, w1, b1, g, be, w2, b2):
        h = x @ w1 + b1
        mu = h.mean(-1, keepdims=True)
        var = ((h - mu) ** 2).mean(-1, keepdims=True)
        h = (h - mu) / jnp.sqrt(var + LN_EPS) * g + be
        h = jax.nn.relu(h)
        return jax.nn.sigmoid(h @ w2 + b2)

    x_up = branch(upstream, p["w11"], p["b11"], p["g11"], p["be11"],
                  p["w12"], p["b12"])
    x_down = branch(downstream, p["w21"], p["b21"], p["g21"], p["be21"],
                    p["w22"], p["b22"])
    x = jnp.concatenate((x_up, x_down), axis=2)        # (B, N, 2)
    out = x @ p["w3"].T + p["b3"][0, 0]                # (B, N, 1)
    return out[..., 0].transpose(1, 0)                 # (N, B)


if __name__ == "__main__":
    T, H = 8, 32                 # num_timesteps_input, hidden_units
    scalar = 1.0                 # stored but unused in forward

    key = jax.random.PRNGKey(0)
    k_params, k1, k2, k3, k4 = jax.random.split(key, 5)
    params = init_params(k_params, T, H)

    # Case 1: tiny shapes, single full-extent block (M = 16).
    B, N = 2, 8
    up = jax.random.normal(k1, (B, N, T), jnp.float32)
    down = jax.random.normal(k2, (B, N, T), jnp.float32)
    out = jax.block_until_ready(velocity_model_nam_forward(up, down, params))
    ref = reference_forward(up, down, params)
    assert out.shape == (N, B), out.shape
    assert jnp.allclose(out, ref, atol=1e-5, rtol=1e-5), (
        float(jnp.max(jnp.abs(out - ref))))

    # Case 2: lane-dense tiled path (M = 256, two 128-wide parallel grid steps).
    B, N = 4, 64
    up = jax.random.normal(k3, (B, N, T), jnp.float32)
    down = jax.random.normal(k4, (B, N, T), jnp.float32)
    out = jax.block_until_ready(
        velocity_model_nam_forward(up, down, params, tile_m=128))
    ref = reference_forward(up, down, params)
    assert out.shape == (N, B), out.shape
    assert jnp.allclose(out, ref, atol=1e-5, rtol=1e-5), (
        float(jnp.max(jnp.abs(out - ref))))

    print("KERNEL_OK")
</pallas_src>

<mosaic_0001>
module attributes {stable_mosaic.version = 11 : i64} {
  func.func @_velocity_kernel(%arg0: i32, %arg1: memref<16x8xf32, #tpu.memory_space<vmem>>, %arg2: memref<16x8xf32, #tpu.memory_space<vmem>>, %arg3: memref<64x8xf32, #tpu.memory_space<vmem>>, %arg4: memref<2x32xf32, #tpu.memory_space<vmem>>, %arg5: memref<64x3xf32, #tpu.memory_space<vmem>>, %arg6: memref<5xf32, #tpu.memory_space<smem>>, %arg7: memref<1x16xf32, #tpu.memory_space<vmem>>) attributes {dimension_semantics = [#tpu.dimension_semantics<parallel>], iteration_bounds = array<i64: 1>, scalar_prefetch = 0 : i64, scratch_operands = 0 : i64, tpu.core_type = #tpu.core_type<tc>, window_params = [{transform_indices = @transform_0, window_bounds = array<i64: 16, 8>}, {transform_indices = @transform_1, window_bounds = array<i64: 16, 8>}, {pipeline_mode = #tpu.pipeline_mode<synchronous>, transform_indices = @transform_2, window_bounds = array<i64: 64, 8>}, {pipeline_mode = #tpu.pipeline_mode<synchronous>, transform_indices = @transform_3, window_bounds = array<i64: 2, 32>}, {pipeline_mode = #tpu.pipeline_mode<synchronous>, transform_indices = @transform_4, window_bounds = array<i64: 64, 3>}, {transform_indices = @transform_5, window_bounds = array<i64: 5>}, {transform_indices = @transform_6, window_bounds = array<i64: 1, 16>}]} {
    %c0 = arith.constant 0 : index
    %c0_0 = arith.constant 0 : index
    %0 = vector.load %arg3[%c0, %c0_0] : memref<64x8xf32, #tpu.memory_space<vmem>>, vector<64x8xf32>
    %c0_1 = arith.constant 0 : index
    %c0_2 = arith.constant 0 : index
    %1 = vector.load %arg5[%c0_1, %c0_2] : memref<64x3xf32, #tpu.memory_space<vmem>>, vector<64x3xf32>
    %2 = vector.extract_strided_slice %1 {offsets = [0, 0], sizes = [64, 1], strides = [1, 1]} : vector<64x3xf32> to vector<64x1xf32>
    %3 = vector.extract_strided_slice %1 {offsets = [0, 1], sizes = [64, 1], strides = [1, 1]} : vector<64x3xf32> to vector<64x1xf32>
    %4 = vector.extract_strided_slice %1 {offsets = [0, 2], sizes = [64, 1], strides = [1, 1]} : vector<64x3xf32> to vector<64x1xf32>
    %c0_3 = arith.constant 0 : index
    %c0_4 = arith.constant 0 : index
    %5 = vector.load %arg1[%c0_3, %c0_4] : memref<16x8xf32, #tpu.memory_space<vmem>>, vector<16x8xf32>
    %6 = vector.extract_strided_slice %0 {offsets = [0, 0], sizes = [32, 8], strides = [1, 1]} : vector<64x8xf32> to vector<32x8xf32>
    %7 = vector.extract_strided_slice %2 {offsets = [0, 0], sizes = [32, 1], strides = [1, 1]} : vector<64x1xf32> to vector<32x1xf32>
    %8 = vector.extract_strided_slice %3 {offsets = [0, 0], sizes = [32, 1], strides = [1, 1]} : vector<64x1xf32> to vector<32x1xf32>
    %9 = vector.extract_strided_slice %4 {offsets = [0, 0], sizes = [32, 1], strides = [1, 1]} : vector<64x1xf32> to vector<32x1xf32>
    %c0_5 = arith.constant 0 : index
    %c0_6 = arith.constant 0 : index
    %10 = vector.load %arg4[%c0_5, %c0_6] : memref<2x32xf32, #tpu.memory_space<vmem>>, vector<1x32xf32>
    %c0_7 = arith.constant 0 : index
    %11 = memref.load %arg6[%c0_7] : memref<5xf32, #tpu.memory_space<smem>>
    %cst = arith.constant dense<0.000000e+00> : vector<32x16xf32>
    %12 = tpu.matmul %6, %5, %cst {dimension_numbers = #tpu.dot_dimension_numbers<[1], [1], [0], [0], [0, 0, 1, 0], [], []>} : vector<32x8xf32>, vector<16x8xf32>, vector<32x16xf32> -> vector<32x16xf32>
    %13 = vector.broadcast %7 : vector<32x1xf32> to vector<32x16xf32>
    %14 = arith.addf %12, %13 : vector<32x16xf32>
    %cst_8 = arith.constant dense<0.000000e+00> : vector<16xf32>
    %15 = vector.multi_reduction <add>, %14, %cst_8 [0] : vector<32x16xf32> to vector<16xf32>
    %16 = vector.shape_cast %15 : vector<16xf32> to vector<1x16xf32>
    %cst_9 = arith.constant 3.200000e+01 : f32
    %17 = vector.broadcast %cst_9 : f32 to vector<1x16xf32>
    %18 = arith.divf %16, %17 : vector<1x16xf32>
    %19 = arith.mulf %14, %14 : vector<32x16xf32>
    %cst_10 = arith.constant dense<0.000000e+00> : vector<16xf32>
    %20 = vector.multi_reduction <add>, %19, %cst_10 [0] : vector<32x16xf32> to vector<16xf32>
    %21 = vector.shape_cast %20 : vector<16xf32> to vector<1x16xf32>
    %cst_11 = arith.constant 3.200000e+01 : f32
    %22 = vector.broadcast %cst_11 : f32 to vector<1x16xf32>
    %23 = arith.divf %21, %22 : vector<1x16xf32>
    %24 = arith.mulf %18, %18 : vector<1x16xf32>
    %25 = arith.subf %23, %24 : vector<1x16xf32>
    %cst_12 = arith.constant 0.000000e+00 : f32
    %26 = vector.broadcast %cst_12 : f32 to vector<1x16xf32>
    %27 = arith.maximumf %25, %26 : vector<1x16xf32>
    %28 = vector.broadcast %18 : vector<1x16xf32> to vector<32x16xf32>
    %29 = arith.subf %14, %28 : vector<32x16xf32>
    %cst_13 = arith.constant 9.99999974E-6 : f32
    %30 = vector.broadcast %cst_13 : f32 to vector<1x16xf32>
    %31 = arith.addf %27, %30 : vector<1x16xf32>
    %32 = math.rsqrt %31 : vector<1x16xf32>
    %33 = vector.broadcast %32 : vector<1x16xf32> to vector<32x16xf32>
    %34 = arith.mulf %29, %33 : vector<32x16xf32>
    %35 = vector.broadcast %8 : vector<32x1xf32> to vector<32x16xf32>
    %36 = arith.mulf %34, %35 : vector<32x16xf32>
    %37 = vector.broadcast %9 : vector<32x1xf32> to vector<32x16xf32>
    %38 = arith.addf %36, %37 : vector<32x16xf32>
    %cst_14 = arith.constant 0.000000e+00 : f32
    %39 = vector.broadcast %cst_14 : f32 to vector<32x16xf32>
    %40 = arith.maximumf %38, %39 : vector<32x16xf32>
    %cst_15 = arith.constant dense<0.000000e+00> : vector<1x16xf32>
    %41 = tpu.matmul %10, %40, %cst_15 {dimension_numbers = #tpu.dot_dimension_numbers<[1], [0], [0], [1], [0, 0, 1, 1], [], []>} : vector<1x32xf32>, vector<32x16xf32>, vector<1x16xf32> -> vector<1x16xf32>
    %42 = vector.broadcast %11 : f32 to vector<1x16xf32>
    %43 = arith.addf %41, %42 : vector<1x16xf32>
    %44 = arith.negf %43 : vector<1x16xf32>
    %45 = math.exp %44 : vector<1x16xf32>
    %cst_16 = arith.constant 1.000000e+00 : f32
    %46 = vector.broadcast %cst_16 : f32 to vector<1x16xf32>
    %47 = arith.addf %46, %45 : vector<1x16xf32>
    %48 = arith.divf %46, %47 : vector<1x16xf32>
    %c0_17 = arith.constant 0 : index
    %c0_18 = arith.constant 0 : index
    %49 = vector.load %arg2[%c0_17, %c0_18] : memref<16x8xf32, #tpu.memory_space<vmem>>, vector<16x8xf32>
    %50 = vector.extract_strided_slice %0 {offsets = [32, 0], sizes = [32, 8], strides = [1, 1]} : vector<64x8xf32> to vector<32x8xf32>
    %51 = vector.extract_strided_slice %2 {offsets = [32, 0], sizes = [32, 1], strides = [1, 1]} : vector<64x1xf32> to vector<32x1xf32>
    %52 = vector.extract_strided_slice %3 {offsets = [32, 0], sizes = [32, 1], strides = [1, 1]} : vector<64x1xf32> to vector<32x1xf32>
    %53 = vector.extract_strided_slice %4 {offsets = [32, 0], sizes = [32, 1], strides = [1, 1]} : vector<64x1xf32> to vector<32x1xf32>
    %c1 = arith.constant 1 : index
    %c0_19 = arith.constant 0 : index
    %54 = vector.load %arg4[%c1, %c0_19] : memref<2x32xf32, #tpu.memory_space<vmem>>, vector<1x32xf32>
    %c1_20 = arith.constant 1 : index
    %55 = memref.load %arg6[%c1_20] : memref<5xf32, #tpu.memory_space<smem>>
    %cst_21 = arith.constant dense<0.000000e+00> : vector<32x16xf32>
    %56 = tpu.matmul %50, %49, %cst_21 {dimension_numbers = #tpu.dot_dimension_numbers<[1], [1], [0], [0], [0, 0, 1, 0], [], []>} : vector<32x8xf32>, vector<16x8xf32>, vector<32x16xf32> -> vector<32x16xf32>
    %57 = vector.broadcast %51 : vector<32x1xf32> to vector<32x16xf32>
    %58 = arith.addf %56, %57 : vector<32x16xf32>
    %cst_22 = arith.constant dense<0.000000e+00> : vector<16xf32>
    %59 = vector.multi_reduction <add>, %58, %cst_22 [0] : vector<32x16xf32> to vector<16xf32>
    %60 = vector.shape_cast %59 : vector<16xf32> to vector<1x16xf32>
    %cst_23 = arith.constant 3.200000e+01 : f32
    %61 = vector.broadcast %cst_23 : f32 to vector<1x16xf32>
    %62 = arith.divf %60, %61 : vector<1x16xf32>
    %63 = arith.mulf %58, %58 : vector<32x16xf32>
    %cst_24 = arith.constant dense<0.000000e+00> : vector<16xf32>
    %64 = vector.multi_reduction <add>, %63, %cst_24 [0] : vector<32x16xf32> to vector<16xf32>
    %65 = vector.shape_cast %64 : vector<16xf32> to vector<1x16xf32>
    %cst_25 = arith.constant 3.200000e+01 : f32
    %66 = vector.broadcast %cst_25 : f32 to vector<1x16xf32>
    %67 = arith.divf %65, %66 : vector<1x16xf32>
    %68 = arith.mulf %62, %62 : vector<1x16xf32>
    %69 = arith.subf %67, %68 : vector<1x16xf32>
    %cst_26 = arith.constant 0.000000e+00 : f32
    %70 = vector.broadcast %cst_26 : f32 to vector<1x16xf32>
    %71 = arith.maximumf %69, %70 : vector<1x16xf32>
    %72 = vector.broadcast %62 : vector<1x16xf32> to vector<32x16xf32>
    %73 = arith.subf %58, %72 : vector<32x16xf32>
    %cst_27 = arith.constant 9.99999974E-6 : f32
    %74 = vector.broadcast %cst_27 : f32 to vector<1x16xf32>
    %75 = arith.addf %71, %74 : vector<1x16xf32>
    %76 = math.rsqrt %75 : vector<1x16xf32>
    %77 = vector.broadcast %76 : vector<1x16xf32> to vector<32x16xf32>
    %78 = arith.mulf %73, %77 : vector<32x16xf32>
    %79 = vector.broadcast %52 : vector<32x1xf32> to vector<32x16xf32>
    %80 = arith.mulf %78, %79 : vector<32x16xf32>
    %81 = vector.broadcast %53 : vector<32x1xf32> to vector<32x16xf32>
    %82 = arith.addf %80, %81 : vector<32x16xf32>
    %cst_28 = arith.constant 0.000000e+00 : f32
    %83 = vector.broadcast %cst_28 : f32 to vector<32x16xf32>
    %84 = arith.maximumf %82, %83 : vector<32x16xf32>
    %cst_29 = arith.constant dense<0.000000e+00> : vector<1x16xf32>
    %85 = tpu.matmul %54, %84, %cst_29 {dimension_numbers = #tpu.dot_dimension_numbers<[1], [0], [0], [1], [0, 0, 1, 1], [], []>} : vector<1x32xf32>, vector<32x16xf32>, vector<1x16xf32> -> vector<1x16xf32>
    %86 = vector.broadcast %55 : f32 to vector<1x16xf32>
    %87 = arith.addf %85, %86 : vector<1x16xf32>
    %88 = arith.negf %87 : vector<1x16xf32>
    %89 = math.exp %88 : vector<1x16xf32>
    %cst_30 = arith.constant 1.000000e+00 : f32
    %90 = vector.broadcast %cst_30 : f32 to vector<1x16xf32>
    %91 = arith.addf %90, %89 : vector<1x16xf32>
    %92 = arith.divf %90, %91 : vector<1x16xf32>
    %c2 = arith.constant 2 : index
    %93 = memref.load %arg6[%c2] : memref<5xf32, #tpu.memory_space<smem>>
    %94 = vector.broadcast %93 : f32 to vector<1x16xf32>
    %95 = arith.mulf %48, %94 : vector<1x16xf32>
    %c3 = arith.constant 3 : index
    %96 = memref.load %arg6[%c3] : memref<5xf32, #tpu.memory_space<smem>>
    %97 = vector.broadcast %96 : f32 to vector<1x16xf32>
    %98 = arith.mulf %92, %97 : vector<1x16xf32>
    %99 = arith.addf %95, %98 : vector<1x16xf32>
    %c4 = arith.constant 4 : index
    %100 = memref.load %arg6[%c4] : memref<5xf32, #tpu.memory_space<smem>>
    %101 = vector.broadcast %100 : f32 to vector<1x16xf32>
    %102 = arith.addf %99, %101 : vector<1x16xf32>
    %c0_31 = arith.constant 0 : index
    %c0_32 = arith.constant 0 : index
    %103 = vector.load %arg7[%c0_31, %c0_32] : memref<1x16xf32, #tpu.memory_space<vmem>>, vector<1x16xf32>
    tpu.vector_store %arg7[%c0_31, %c0_32], %102 {strides = array<i32>} : memref<1x16xf32, #tpu.memory_space<vmem>>, vector<1x16xf32>,
    return
  }
  func.func @transform_0(%arg0: i32) -> (i32, i32) {
    %c0_i32 = arith.constant 0 : i32
    %c0_i32_0 = arith.constant 0 : i32
    return %arg0, %c0_i32 : i32, i32
  }
  func.func @transform_1(%arg0: i32) -> (i32, i32) {
    %c0_i32 = arith.constant 0 : i32
    %c0_i32_0 = arith.constant 0 : i32
    return %arg0, %c0_i32 : i32, i32
  }
  func.func @transform_2(%arg0: i32) -> (i32, i32) {
    %c0_i32 = arith.constant 0 : i32
    %c0_i32_0 = arith.constant 0 : i32
    %c0_i32_1 = arith.constant 0 : i32
    return %c0_i32, %c0_i32_0 : i32, i32
  }
  func.func @transform_3(%arg0: i32) -> (i32, i32) {
    %c0_i32 = arith.constant 0 : i32
    %c0_i32_0 = arith.constant 0 : i32
    %c0_i32_1 = arith.constant 0 : i32
    return %c0_i32, %c0_i32_0 : i32, i32
  }
  func.func @transform_4(%arg0: i32) -> (i32, i32) {
    %c0_i32 = arith.constant 0 : i32
    %c0_i32_0 = arith.constant 0 : i32
    %c0_i32_1 = arith.constant 0 : i32
    return %c0_i32, %c0_i32_0 : i32, i32
  }
  func.func @transform_5(%arg0: i32) -> i32 {
    %c0_i32 = arith.constant 0 : i32
    %c0_i32_0 = arith.constant 0 : i32
    return %c0_i32 : i32
  }
  func.func @transform_6(%arg0: i32) -> (i32, i32) {
    %c0_i32 = arith.constant 0 : i32
    %c0_i32_0 = arith.constant 0 : i32
    return %c0_i32, %arg0 : i32, i32
  }
}

</mosaic_0001>

<bundles_post_ra>
// kernel: tpu_custom_call.1
= control target key start
LH: loop header
LB: loop body
LE: loop exit
PB: predicated region body
PF: predicated region fallthrough
CT: control target
= control target key end

     0   :  { %11 = vsyncpa [#allocation4], 0  ;;  %s1081_s0 = inlined_call_operand.vmem [shape: f32[16,8], index: 0, kind: input, shape index: {}]   ;;  %s1082_s1 = inlined_call_operand.vmem [shape: f32[16,8], index: 1, kind: input, shape index: {}]   ;;  %s1083_s2 = inlined_call_operand.vmem [shape: f32[64,8], index: 2, kind: input, shape index: {}]   ;;  %s1084_s3 = inlined_call_operand.vmem [shape: f32[2,32], index: 3, kind: input, shape index: {}]   ;;  %s1085_s4 = inlined_call_operand.vmem [shape: f32[64,3], index: 4, kind: input, shape index: {}]   ;;  %s1086_s5 = inlined_call_operand.vmem [shape: f32[5], index: 5, kind: input, shape index: {}]   ;;  %s1087_s6 = inlined_call_operand.hbm [shape: f32[1,16], index: 6, kind: output, shape index: {}]  }
   0x1   :  { %12 = vsyncpa [#allocation3], 0  ;;  %s29_s23 = sshll.u32 %s1086_s5, 4  ;;  %s30_s23 = int_to_ptr.vmem [resolvable:$true] %s29_s23 }
   0x2   :  { %s816_s24 = scalar_lea.vmem %s30_s23, 16  ;;  %p821_p1 = scmp.lt.s32.totalorder %s30_s23, %s30_s23 }
   0x3   :  { %p817_p0 = scmp.ne.s32.totalorder %s30_s23, %s816_s24  ;;  %p822_p2 = scmp.lt.s32.totalorder %s816_s24, %s816_s24 }
   0x5   :  { %p823_p3 = por %p822_p2, %p821_p1 }
   0x7   :  { %p824_p4 = pnand %p823_p3, %p817_p0 }
   0x9   :  { %827 = shalt.err (!%p824_p4)
}
   0xa   :  { %s854_s25 = smov [#allocation2]  }
   0xb   :  { %32 = dma.vmem_to_smem %s30_s23, 16, %s854_s25, [#allocation4]  }
   0xc   :  { %850 = dma.done.wait [#allocation4], 16  }
   0xd   :  { %851 = vsyncadd [#allocation4], 4294967280 }
   0xe   :  { %36 = sfence }
   0xf   :  { %v53_v0 = vld [vmem:[%s1081_s0] sm:$0xff]  ;;  %v54_v1 = vld [vmem:[%s1081_s0 + $0x8] sm:$0xff]  ;;  %vm77_vm0 = vcmask 64512   ;;  %v855_v6 = vmov 0   ;;  %v47_v10 = vld [vmem:[%s1085_s4 + $0x10] sm:$0xff]  ;;  %v856_v24 = vmov 1  }
  0x10   :  { %v37_v2 = vld [vmem:[%s1083_s2] sm:$0xff]  ;;  %v760_v3 = vpack.c.bf16 %v54_v1, %v53_v0  ;;  %vm911_vm1 = vmpackc.low %vm77_vm0, %vm77_vm0  ;;  %792 = vset.pattern.permute.xlu0 %v855_v6  ;;  %v354_v7 = vld [vmem:[%s1082_s1 + $0x8] sm:$0xff]  ;;  %793 = vset.pattern.permute.xlu1 %v855_v6  ;;  %v857_v25 = vmov 2   ;;  %v858_v26 = vmov 0.0|0.0   ;;  %vm859_vm2 = vmmov 0   ;;  %s56_s14 = sld [smem:[#allocation2]] }
  0x11   :  { %722 = vmatprep.mubr.msk.f32.mxu0 %vm77_vm0, %v37_v2  ;;  %v353_v5 = vld [vmem:[%s1082_s1] sm:$0xff]  ;;  %69 = vperm.xlu1 %793, %v47_v10   ;;  %v46_v11 = vld [vmem:[%s1085_s4 + $0x8] sm:$0xff]  ;;  %v48_v12 = vld [vmem:[%s1085_s4 + $0x18] sm:$0xff]  ;;  %v860_v27 = vmov 0.0   ;;  %vm181_vm3 = vcmask 130048   ;;  %vm273_vm4 = vcmask 261120  }
  0x12   :  { %762 = vmatprep.subr.msk.bf16.mxu0 %vm911_vm1, %v760_v3  ;;  %v772_v8 = vpack.c.bf16 %v354_v7, %v353_v5  ;;  %v45_v9 = vld [vmem:[%s1085_s4] sm:$0xff]  ;;  %v38_v13 = vld [vmem:[%s1083_s2 + $0x8] sm:$0xff]  ;;  %v39_v14 = vld [vmem:[%s1083_s2 + $0x10] sm:$0xff]  ;;  %766 = vmatprep.subr.bf16.mxu1 %v858_v26  ;;  %s684_s15 = sld [smem:[#allocation2 + $0x1]]  ;;  %s694_s16 = sld [smem:[#allocation2 + $0x3]]  ;;  %vm659_vm5 = vcmask 122880  }
  0x13   :  { %765 = vmatpush3.bf16.xpose.msk.msra.mxu0 %vm911_vm1, %v760_v3  ;;  %59 = vperm.xlu0 %792, %v45_v9   ;;  %v49_v15 = vld [vmem:[%s1085_s4 + $0x20] sm:$0xff]  ;;  %v50_v16 = vld [vmem:[%s1085_s4 + $0x28] sm:$0xff]  ;;  %v40_v17 = vld [vmem:[%s1083_s2 + $0x18] sm:$0xff]  ;;  %s695_s17 = sld [smem:[#allocation2 + $0x4]]  ;;  %s861_s18 = smov [#allocation5]  }
  0x14   :  { %774 = vmatprep.subr.msk.bf16.mxu0 %vm911_vm1, %v772_v8  ;;  %v41_v18 = vld [vmem:[%s1083_s2 + $0x20] sm:$0xff]  ;;  %v51_v19 = vld [vmem:[%s1085_s4 + $0x30] sm:$0xff]  ;;  %v52_v20 = vld [vmem:[%s1085_s4 + $0x38] sm:$0xff]  ;;  %736 = vmatprep.mubr.msk.f32.mxu1 %vm859_vm2, %v860_v27  ;;  %s667_s19 = sshll.u32 %s861_s18, 4  ;;  %s668_s19 = int_to_ptr.vmem [resolvable:$true] %s667_s19 }
  0x15   :  { %74 = vperm.xlu1 %793, %v48_v12   ;;  %v42_v21 = vld [vmem:[%s1083_s2 + $0x28] sm:$0xff]  ;;  %v43_v22 = vld [vmem:[%s1083_s2 + $0x30] sm:$0xff]  ;;  %v44_v23 = vld [vmem:[%s1083_s2 + $0x38] sm:$0xff]  ;;  %s828_s20 = scalar_lea.vmem %s668_s19, 16  ;;  %s832_s21 = scalar_lea.vmem %s668_s19, 32 }
  0x16   :  { %p829_p5 = scmp.ne.s32.totalorder %s668_s19, %s828_s20  ;;  %p833_p6 = scmp.lt.s32.totalorder %s668_s19, %s668_s19 }
  0x17   :  { %64 = vperm.xlu0 %792, %v46_v11   ;;  %p834_p7 = scmp.lt.s32.totalorder %s832_s21, %s828_s20 }
  0x19   :  { %364 = vperm.xlu1 %793, %v50_v16   ;;  %p835_p8 = por %p834_p7, %p833_p6 }
  0x1a   :  { %723 = vmatmul.mubr.msk.f32.vlgmr.msra.gmra.mrb[0].mxu0 %vm77_vm0, %v38_v13 }
  0x1b   :  { %777 = vmatpush3.bf16.xpose.msk.msra.mxu0 %vm911_vm1, %v772_v8  ;;  %725 = vmatprep.mubr.msk.f32.mxu0 %vm77_vm0, %v39_v14  ;;  %p836_p9 = pnand %p835_p8, %p829_p5 }
  0x1c   :  { %359 = vperm.xlu0 %792, %v49_v15  }
  0x1d   :  { %374 = vperm.xlu1 %793, %v52_v20  }
  0x1e   :  { %726 = vmatmul.mubr.msk.f32.gmra.mrb[2].mxu0 %vm77_vm0, %v40_v17 }
  0x1f   :  { %743 = vmatprep.mubr.msk.f32.mxu0 %vm77_vm0, %v41_v18 }
  0x20   :  { %369 = vperm.xlu0 %792, %v51_v19  }
  0x21   :  { %795 = vset.pattern.permute.xlu1 %v856_v24 }
  0x22   :  { %744 = vmatmul.mubr.msk.f32.vlgmr.msra.gmra.mrb[4].mxu0 %vm77_vm0, %v42_v21  ;;  %233 = vperm.xlu1 %795, %v46_v11  }
  0x23   :  { %746 = vmatprep.mubr.msk.f32.mxu0 %vm77_vm0, %v43_v22 }
  0x24   :  { %794 = vset.pattern.permute.xlu0 %v856_v24 }
  0x25   :  { %229 = vperm.xlu0 %794, %v45_v9  }
  0x26   :  { %747 = vmatmul.mubr.msk.f32.gmra.mrb[6].mxu0 %vm77_vm0, %v44_v23  ;;  %796 = vset.pattern.permute.xlu1 %v857_v25 }
  0x27   :  { %249 = vperm.xlu1 %796, %v45_v9  }
  0x29   :  { %526 = vperm.xlu0 %794, %v49_v15  }
  0x2b   :  { %797 = vset.pattern.permute.xlu1 %v856_v24 }
  0x2c   :  { %237 = vperm.xlu1 %797, %v47_v10  }
  0x2d   :  { %799 = vset.pattern.permute.xlu0 %v857_v25 }
  0x2e   :  { %253 = vperm.xlu0 %799, %v46_v11  }
  0x30   :  { %241 = vperm.xlu1 %797, %v48_v12  }
  0x32   :  { %257 = vperm.xlu0 %799, %v47_v10  }
  0x34   :  { %798 = vset.pattern.permute.xlu1 %v857_v25 }
  0x35   :  { %261 = vperm.xlu1 %798, %v48_v12  }
  0x36   :  { %550 = vperm.xlu0 %799, %v50_v16  }
  0x39   :  { %800 = vset.pattern.permute.xlu1 %v856_v24 }
  0x3a   :  { %554 = vperm.xlu0 %799, %v51_v19   ;;  %530 = vperm.xlu1 %800, %v50_v16  }
  0x3e   :  { %801 = vset.pattern.permute.xlu1 %v857_v25 }
  0x3f   :  { %546 = vperm.xlu1 %801, %v49_v15  }
  0x43   :  { %802 = vset.pattern.permute.xlu1 %v856_v24 }
  0x44   :  { %534 = vperm.xlu1 %802, %v51_v19  }
  0x48   :  { %538 = vperm.xlu1 %802, %v52_v20  }
  0x4c   :  { %803 = vset.pattern.permute.xlu1 %v857_v25 }
  0x4d   :  { %558 = vperm.xlu1 %803, %v52_v20  }
  0x90   :  { %v70_v28 = vpop.permute.xlu1 %69 }
  0x92   :  { %v60_v30 = vpop.permute.xlu0 %59 }
  0x94   :  { %v75_v29 = vpop.permute.xlu1 %74 }
  0x96   :  { %v65_v32 = vpop.permute.xlu0 %64 }
  0x98   :  { %v365_v31 = vpop.permute.xlu1 %364 }
  0x9b   :  { %v360_v50 = vpop.permute.xlu0 %359 }
  0x9c   :  { %v375_v34 = vpop.permute.xlu1 %374 }
  0x9f   :  { %v370_v7 = vpop.permute.xlu0 %369 }
  0xa1   :  { %v997_v43 = vpop.permute.xlu1 %233 }
  0xa6   :  { %v1018_v62 = vpop.permute.xlu1 %249 }
  0xab   :  { %v1041_v22 = vpop.permute.xlu1 %237 }
  0xed   :  { %v724_v33 = vpop.f32.mrb[0].mxu0 }
  0xee   :  { %v985_v35 = vadd.f32 %v724_v33, %v65_v32  ;;  %v162_v36 = vpop.f32.mrb[1].mxu0 }
  0xef   :  { %v987_v37 = vadd.f32 %v162_v36, %v60_v30 }
  0xf0   :  { %v183_v38 = vsel %vm181_vm3, %v985_v35, 0.0  ;;  %v198_v39 = vmul.f32 %v985_v35, %v985_v35 }
  0xf1   :  { %v182_v40 = vsel %vm181_vm3, %v987_v37, 0.0  ;;  %v197_v41 = vmul.f32 %v987_v37, %v987_v37  ;;  %v727_v42 = vpop.f32.mrb[2].mxu0 }
  0xf2   :  { %v202_v44 = vsel %vm181_vm3, %v198_v39, 0.0  ;;  %v184_v45 = vadd.f32 %v183_v38, %v182_v40  ;;  %v1000_v46 = vadd.f32 %v727_v42, %v75_v29  ;;  %v172_v47 = vpop.f32.mrb[3].mxu0 }
  0xf3   :  { %v201_v48 = vsel %vm181_vm3, %v197_v41, 0.0  ;;  %v1003_v49 = vadd.f32 %v172_v47, %v70_v28  ;;  %v242_v41 = vpop.permute.xlu1 %241 }
  0xf4   :  { %v203_v51 = vadd.f32 %v202_v44, %v201_v48  ;;  %v200_v52 = vmul.f32 %v1000_v46, %v1000_v46  ;;  %v187_v59 = vsel %vm181_vm3, %v1000_v46, 0.0 }
  0xf5   :  { %v185_v53 = vsel %vm181_vm3, %v1003_v49, 0.0  ;;  %v199_v54 = vmul.f32 %v1003_v49, %v1003_v49  ;;  %v745_v55 = vpop.f32.mrb[4].mxu0 }
  0xf6   :  { %v186_v56 = vadd.f32 %v185_v53, %v184_v45  ;;  %v1011_v57 = vadd.f32 %v745_v55, %v365_v31  ;;  %v461_v58 = vpop.f32.mrb[5].mxu0  ;;  %v206_v3 = vsel %vm181_vm3, %v200_v52, 0.0 }
  0xf7   :  { %v204_v60 = vsel %vm181_vm3, %v199_v54, 0.0  ;;  %v1016_v61 = vadd.f32 %v461_v58, %v360_v50  ;;  %v262_v53 = vpop.permute.xlu1 %261 }
  0xf8   :  { %v188_v63 = vadd.f32 %v187_v59, %v186_v56  ;;  %v205_v0 = vadd.f32 %v204_v60, %v203_v51  ;;  %v481_v1 = vsel %vm181_vm3, %v1011_v57, 0.0  ;;  %v495_v2 = vmul.f32 %v1011_v57, %v1011_v57  ;;  %v230_v59 = vpop.permute.xlu0 %229 }
  0xf9   :  { %v480_v4 = vsel %vm181_vm3, %v1016_v61, 0.0  ;;  %v494_v5 = vmul.f32 %v1016_v61, %v1016_v61  ;;  %v748_v6 = vpop.f32.mrb[6].mxu0 }
  0xfa   :  { %v189_v8 = vrot.slane %v188_v63, 4  ;;  %v207_v9 = vadd.f32 %v206_v3, %v205_v0  ;;  %v499_v10 = vsel %vm181_vm3, %v495_v2, 0.0  ;;  %v482_v11 = vadd.f32 %v481_v1, %v480_v4  ;;  %v471_v12 = vpop.f32.mrb[7].mxu0 }
  0xfb   :  { %v498_v13 = vsel %vm181_vm3, %v494_v5, 0.0  ;;  %v1031_v14 = vadd.f32 %v748_v6, %v375_v34  ;;  %v1033_v15 = vadd.f32 %v471_v12, %v370_v7 }
  0xfc   :  { %v190_v16 = vadd.f32 %v189_v8, %v188_v63  ;;  %v208_v17 = vrot.slane %v207_v9, 4  ;;  %v500_v18 = vadd.f32 %v499_v10, %v498_v13  ;;  %v531_v8 = vpop.permute.xlu1 %530  ;;  %v527_v12 = vpop.permute.xlu0 %526 }
  0xfd   :  { %v497_v19 = vmul.f32 %v1031_v14, %v1031_v14  ;;  %v483_v20 = vsel %vm181_vm3, %v1033_v15, 0.0  ;;  %v496_v21 = vmul.f32 %v1033_v15, %v1033_v15  ;;  %v485_v28 = vsel %vm181_vm3, %v1031_v14, 0.0 }
  0xfe   :  { %v191_v23 = vrot.slane %v190_v16, 2  ;;  %v209_v24 = vadd.f32 %v208_v17, %v207_v9  ;;  %v484_v25 = vadd.f32 %v483_v20, %v482_v11 }
  0xff   :  { %v501_v29 = vsel %vm181_vm3, %v496_v21, 0.0  ;;  %v503_v34 = vsel %vm181_vm3, %v497_v19, 0.0 }
 0x100   :  { %v192_v30 = vadd.f32 %v191_v23, %v190_v16  ;;  %v210_v31 = vrot.slane %v209_v24, 2  ;;  %v486_v32 = vadd.f32 %v485_v28, %v484_v25  ;;  %v502_v33 = vadd.f32 %v501_v29, %v500_v18  ;;  %v547_v18 = vpop.permute.xlu1 %546  ;;  %v254_v20 = vpop.permute.xlu0 %253 }
 0x102   :  { %v193_v36 = vrot.slane %v192_v30, 1  ;;  %v211_v38 = vadd.f32 %v210_v31, %v209_v24  ;;  %v487_v39 = vrot.slane %v486_v32, 4  ;;  %v504_v40 = vadd.f32 %v503_v34, %v502_v33 }
 0x104   :  { %v194_v42 = vadd.f32 %v193_v36, %v192_v30  ;;  %v212_v44 = vrot.slane %v211_v38, 1  ;;  %v488_v45 = vadd.f32 %v487_v39, %v486_v32  ;;  %v505_v47 = vrot.slane %v504_v40, 4  ;;  %v535_v23 = vpop.permute.xlu1 %534  ;;  %v258_v25 = vpop.permute.xlu0 %257 }
 0x106   :  { %v196_v48 = vmul.f32 0.03125, %v194_v42  ;;  %v213_v50 = vadd.f32 %v212_v44, %v211_v38  ;;  %v489_v51 = vrot.slane %v488_v45, 2  ;;  %v506_v52 = vadd.f32 %v505_v47, %v504_v40 }
 0x108   :  { %v214_v54 = vmul.f32 0.03125, %v213_v50  ;;  %v215_v55 = vmul.f32 %v196_v48, %v196_v48  ;;  %v490_v56 = vadd.f32 %v489_v51, %v488_v45  ;;  %v507_v58 = vrot.slane %v506_v52, 2  ;;  %v539_v38 = vpop.permute.xlu1 %538  ;;  %v551_v39 = vpop.permute.xlu0 %550 }
 0x109   :  { %v219_v60 = vsub.f32 %v985_v35, %v196_v48  ;;  %v220_v63 = vsub.f32 %v1003_v49, %v196_v48  ;;  %v221_v0 = vsub.f32 %v1000_v46, %v196_v48  ;;  %v218_v1 = vsub.f32 %v987_v37, %v196_v48 }
 0x10a   :  { %v216_v2 = vsub.f32 %v214_v54, %v215_v55  ;;  %v491_v3 = vrot.slane %v490_v56, 1  ;;  %v508_v4 = vadd.f32 %v507_v58, %v506_v52 }
 0x10c   :  { %v217_v5 = vmax.f32 %v216_v2, 0.0  ;;  %v492_v6 = vadd.f32 %v491_v3, %v490_v56  ;;  %v509_v7 = vrot.slane %v508_v4, 1 }
 0x10e   :  { %v222_v9 = vadd.f32 1e-05, %v217_v5  ;;  %v493_v10 = vmul.f32 0.03125, %v492_v6  ;;  %v510_v11 = vadd.f32 %v509_v7, %v508_v4  ;;  %v55_v4 = vld [vmem:[%s1084_s3] sm:$0x1] }
 0x10f   :  { %v355_v7 = vld [vmem:[%s1084_s3 + $0x1] sm:$0x1]  ;;  %s693_s3 = sld [smem:[#allocation2 + $0x2]] }
 0x110   :  { %804 = vrsqrt.f32 %v222_v9  ;;  %v511_v13 = vmul.f32 0.03125, %v510_v11  ;;  %v512_v35 = vmul.f32 %v493_v10, %v493_v10  ;;  %v515_v49 = vsub.f32 %v1016_v61, %v493_v10 }
 0x111   :  { %v516_v46 = vsub.f32 %v1011_v57, %v493_v10  ;;  %v517_v37 = vsub.f32 %v1033_v15, %v493_v10  ;;  %v518_v16 = vsub.f32 %v1031_v14, %v493_v10 }
 0x112   :  { %v513_v17 = vsub.f32 %v511_v13, %v512_v35  ;;  %v569_v13 = vstv %s684_s15 }
 0x114   :  { %v514_v19 = vmax.f32 %v513_v17, 0.0 }
 0x116   :  { %v519_v21 = vadd.f32 1e-05, %v514_v19  ;;  %v650_v19 = vstv %s693_s3 }
 0x118   :  { %806 = vrsqrt.f32 %v519_v21 }
 0x11a   :  { %v805_v24 = vpop.eup %804 }
 0x11b   :  { %v225_v28 = vmul.f32 %v805_v24, %v219_v60  ;;  %v226_v29 = vmul.f32 %v805_v24, %v220_v63  ;;  %v227_v30 = vmul.f32 %v805_v24, %v221_v0  ;;  %v224_v31 = vmul.f32 %v805_v24, %v218_v1 }
 0x11d   :  { %v245_v61 = vmul.f32 %v997_v43, %v225_v28  ;;  %v246_v57 = vmul.f32 %v1041_v22, %v226_v29  ;;  %v247_v15 = vmul.f32 %v242_v41, %v227_v30  ;;  %v244_v32 = vmul.f32 %v230_v59, %v224_v31 }
 0x11f   :  { %v264_v14 = vadd.f32 %v1018_v62, %v244_v32  ;;  %v267_v33 = vadd.f32 %v262_v53, %v247_v15  ;;  %v265_v34 = vadd.f32 %v254_v20, %v245_v61  ;;  %v266_v36 = vadd.f32 %v258_v25, %v246_v57  ;;  %v559_v62 = vpop.permute.xlu1 %558  ;;  %v555_v53 = vpop.permute.xlu0 %554 }
 0x120   :  { %v653_v20 = vstv %s694_s16  ;;  %v657_v25 = vstv %s695_s17 }
 0x121   :  { %v268_v40 = vmax.f32 %v264_v14, 0.0  ;;  %v271_v42 = vmax.f32 %v267_v33, 0.0  ;;  %v269_v44 = vmax.f32 %v265_v34, 0.0  ;;  %v270_v45 = vmax.f32 %v266_v36, 0.0 }
 0x122   :  { %v807_v47 = vpop.eup %806 }
 0x123   :  { %v521_v48 = vmul.f32 %v807_v47, %v515_v49  ;;  %v522_v50 = vmul.f32 %v807_v47, %v516_v46  ;;  %v770_v51 = vpack.c.bf16 %v271_v42, %v270_v45  ;;  %v523_v43 = vmul.f32 %v807_v47, %v517_v37 }
 0x124   :  { %v524_v52 = vmul.f32 %v807_v47, %v518_v16  ;;  %v767_v22 = vpack.c.bf16 %v269_v44, %v268_v40 }
 0x125   :  { %v541_v41 = vmul.f32 %v527_v12, %v521_v48  ;;  %v542_v54 = vmul.f32 %v531_v8, %v522_v50  ;;  %v543_v55 = vmul.f32 %v535_v23, %v523_v43  ;;  %v272_v8 = vstv %s56_s14 }
 0x126   :  { %v544_v56 = vmul.f32 %v539_v38, %v524_v52  ;;  %768 = vmatpush3.bf16.msra.mxu1 %v767_v22 }
 0x127   :  { %v561_v58 = vadd.f32 %v547_v18, %v541_v41  ;;  %v562_v59 = vadd.f32 %v551_v39, %v542_v54  ;;  %v563_v60 = vadd.f32 %v555_v53, %v543_v55  ;;  %769 = vmatprep.subr.bf16.mxu1 %v858_v26 }
 0x128   :  { %v564_v63 = vadd.f32 %v559_v62, %v544_v56 }
 0x129   :  { %v565_v0 = vmax.f32 %v561_v58, 0.0  ;;  %v566_v1 = vmax.f32 %v562_v59, 0.0  ;;  %v567_v2 = vmax.f32 %v563_v60, 0.0 }
 0x12a   :  { %v568_v3 = vmax.f32 %v564_v63, 0.0  ;;  %771 = vmatpush3.bf16.msra.mxu1 %v770_v51 }
 0x12b   :  { %v779_v5 = vpack.c.bf16 %v566_v1, %v565_v0  ;;  %778 = vmatprep.subr.bf16.mxu1 %v858_v26 }
 0x12c   :  { %v782_v6 = vpack.c.bf16 %v568_v3, %v567_v2 }
 0x12d   :  { %737 = vmatmul.mubr.msk.f32.vlgmr.msra.gmra.mrb[0].mxu1 %vm273_vm4, %v55_v4 }
 0x12e   :  { %780 = vmatpush3.bf16.msra.mxu1 %v779_v5  ;;  %757 = vmatprep.mubr.msk.f32.mxu1 %vm859_vm2, %v860_v27 }
 0x12f   :  { %781 = vmatprep.subr.bf16.mxu1 %v858_v26 }
 0x132   :  { %783 = vmatpush3.bf16.msra.mxu1 %v782_v6 }
 0x135   :  { %758 = vmatmul.mubr.msk.f32.vlgmr.msra.gmra.mrb[2].mxu1 %vm273_vm4, %v355_v7 }
 0x200   :  { %v343_v9 = vpop.f32.mrb[0].mxu1 }
 0x201   :  { %v344_v10 = vadd.f32 %v343_v9, %v272_v8  ;;  %v738_v11 = vpop.f32.mrb[1].mxu1 }
 0x203   :  { %v683_v12 = vmul.f32 -1.442695, %v344_v10 }
 0x205   :  { %808 = vpow2.f32 %v683_v12 }
 0x208   :  { %v639_v35 = vpop.f32.mrb[2].mxu1 }
 0x209   :  { %v640_v49 = vadd.f32 %v639_v35, %v569_v13  ;;  %v759_v27 = vpop.f32.mrb[3].mxu1 }
 0x20b   :  { %v692_v46 = vmul.f32 -1.442695, %v640_v49 }
 0x20d   :  { %810 = vpow2.f32 %v692_v46 }
 0x20f   :  { %v809_v26 = vpop.eup %808 }
 0x210   :  { %v350_v37 = vadd.f32 1.0, %v809_v26 }
 0x212   :  { %812 = vrcp.f32 %v350_v37 }
 0x217   :  { %v811_v16 = vpop.eup %810 }
 0x218   :  { %v646_v17 = vadd.f32 1.0, %v811_v16 }
 0x21a   :  { %814 = vrcp.f32 %v646_v17 }
 0x21c   :  { %v813_v18 = vpop.eup %812 }
 0x21d   :  { %v651_v23 = vmul.f32 %v813_v18, %v650_v19 }
 0x224   :  { %v815_v21 = vpop.eup %814 }
 0x225   :  { %v654_v24 = vmul.f32 %v815_v21, %v653_v20 }
 0x227   :  { %v655_v28 = vadd.f32 %v654_v24, %v651_v23 }
 0x229   :  { %v658_v29 = vadd.f32 %v657_v25, %v655_v28 }
 0x22b   :  { %660 = vst.msk [vmem:[#allocation5] sm:$0x1] %vm659_vm5, %v658_v29 }
 0x22c   :  { %839 = shalt.err (!%p836_p9)
}
 0x22d   :  { %s840_s24 = scalar_lea.hbm %s1087_s6, 16 }
 0x22e   :  { %p841_p10 = scmp.ne.s32.totalorder %s1087_s6, %s840_s24  ;;  %p844_p11 = scmp.lt.u32.totalorder %s840_s24, %s1087_s6 }
 0x230   :  { %p846_p12 = pnand %p844_p11, %p841_p10 }
 0x232   :  { %849 = shalt.err (!%p846_p12)
}
 0x233   :  { %670 = dma.vmem_to_hbm [thread:$0]  %s668_s19, 16, %s1087_s6, [#allocation3]  }
 0x234   :  { %852 = dma.done.wait [#allocation3], 16  }
 0x235   :  { %853 = vsyncadd [#allocation3], 4294967280 }
 0x236   :  { %674 = vsyncpa [#allocation3], 1 }
 0x237   :  { %675 = vsyncpa [#allocation4], 1 }

</bundles_post_ra>
